<compile_context>
chip_gen: v7x
topology: tpu7x:2x2x1
jax: 0.10.0
libtpu: 0.0.40
codegen_flags: <defaults>
</compile_context>

<pallas_src>
import functools

import jax
import jax.numpy as jnp
from jax.experimental import pallas as pl
from jax.experimental.pallas import tpu as pltpu


def _nca_kernel(x_ref, w1t_ref, b1_ref, w2t_ref, b2_ref, out_ref, feat_ref,
                *, C, Hp, Q):
    """One grid step = one halo-padded, (w, h)-flattened image.

    x_ref   : (1, C, Lfull)  padded state for this image, f32
    w1t_ref : (128, 9C)      folded perceive+dense1 weight (mxu dtype)
    b1_ref  : (128, 1)       folded dense1 bias (f32)
    w2t_ref : (C, 128)       dense2 weight, torch (out,in) layout (mxu dtype)
    b2_ref  : (C, 1)         dense2 bias (f32)
    out_ref : (1, C, Q)      channels x flattened (w, h) output columns (f32)
    feat_ref: (9C, Q)        VMEM scratch: im2col feature tile (mxu dtype)
    """
    slab = x_ref[0]                                   # (C, Lfull), VMEM resident
    # In-kernel im2col: tap (kh, kw) of output column q = w*Hp + h is input
    # column q + kw*Hp + kh of the flattened, zero-halo-padded image.  Nine
    # static lane-shifted slices fill one (9C, Q) scratch tile -> single K=9C
    # matmul; no 9x-expanded HBM matrix, no in-kernel concat of tiny tensors.
    for kh in range(3):
        for kw in range(3):
            t = kh * 3 + kw                # must match the fold's (kh,kw,cin) order
            shift = kw * Hp + kh
            feat_ref[t * C:(t + 1) * C, :] = (
                slab[:, shift:shift + Q].astype(feat_ref.dtype))
    h1 = jnp.dot(w1t_ref[...], feat_ref[...],
                 preferred_element_type=jnp.float32)          # (128, Q) f32 accum
    h1 = jnp.maximum(h1 + b1_ref[...], 0.0)                   # bias + ReLU in f32
    y = jnp.dot(w2t_ref[...], h1.astype(w2t_ref.dtype),
                preferred_element_type=jnp.float32)           # (C, Q)
    out_ref[0] = y + b2_ref[...]


def _fold_params(params, C, mxu_dtype):
    """Fold perceive (sobel convs + identity tap) and dense1 into one weight."""
    wsx = params["wsx"].astype(jnp.float32)        # (C, C, 3, 3)  OIHW
    wsy = params["wsy"].astype(jnp.float32)
    w1 = params["w1"].astype(jnp.float32)          # (128, 3C)
    w1x, w1y, w1i = w1[:, :C], w1[:, C:2 * C], w1[:, 2 * C:]
    # W_eff[(kh,kw,cin), j] = sum_co wsx[co,cin,kh,kw]*w1[j,co]
    #                        + sum_co wsy[co,cin,kh,kw]*w1[j,C+co]
    #                        + [kh==1 and kw==1] * w1[j, 2C+cin]
    w_eff = (jnp.einsum("oikl,jo->klij", wsx, w1x)
             + jnp.einsum("oikl,jo->klij", wsy, w1y))          # (3,3,C,128)
    w_eff = w_eff.at[1, 1].add(w1i.T)
    w1t = w_eff.reshape(9 * C, -1).T                           # (128, 9C)
    b_eff = w1x @ params["bsx"] + w1y @ params["bsy"] + params["b1"]   # (128,)
    w2 = params["w2"].astype(jnp.float32)                      # (C, 128)
    b2 = params["b2"].astype(jnp.float32)                      # (C,)
    return (w1t.astype(mxu_dtype),
            b_eff.reshape(-1, 1).astype(jnp.float32),
            w2.astype(mxu_dtype),
            b2.reshape(-1, 1))


@functools.partial(jax.jit, static_argnames=("mxu_dtype",))
def nca_forward(x_nchw, params, *, mxu_dtype=jnp.float32):
    """x_nchw: (B, 16, H, W) f32 -> (B, W, H, 16), matching the torch forward."""
    B, C, H, W = x_nchw.shape
    hid = params["w1"].shape[0]
    Hp = H + 2                      # halo-padded image height (fast/lane axis)
    Q = W * Hp                      # per-image output columns (2 junk per w row)
    Lfull = (W + 3) * Hp            # per-image padded + flattened input columns

    w1t, b1, w2t, b2 = _fold_params(params, C, mxu_dtype)

    # One cheap, state-sized prep pass: (B,C,H,W) -> (B,C,W,H) with a zero halo
    # of 1 on each H side and (1 left, 2 right) on W (the extra right column
    # keeps every in-kernel tap slice in-bounds), then flatten (w, h).
    xt = jnp.transpose(x_nchw, (0, 1, 3, 2)).astype(jnp.float32)
    xpad = jnp.pad(xt, ((0, 0), (0, 0), (1, 2), (1, 1)))       # (B, C, W+3, Hp)
    xflat = xpad.reshape(B, C, Lfull)

    kernel = functools.partial(_nca_kernel, C=C, Hp=Hp, Q=Q)
    out = pl.pallas_call(
        kernel,
        out_shape=jax.ShapeDtypeStruct((B, C, Q), jnp.float32),
        grid=(B,),                                             # one image per step
        in_specs=[
            pl.BlockSpec((1, C, Lfull), lambda b: (b, 0, 0)),  # padded state slab
            pl.BlockSpec((hid, 9 * C), lambda b: (0, 0)),      # folded dense1 W
            pl.BlockSpec((hid, 1), lambda b: (0, 0)),          # folded dense1 bias
            pl.BlockSpec((C, hid), lambda b: (0, 0)),          # dense2 weight
            pl.BlockSpec((C, 1), lambda b: (0, 0)),            # dense2 bias
        ],
        out_specs=pl.BlockSpec((1, C, Q), lambda b: (b, 0, 0)),  # lane-dense out
        scratch_shapes=[pltpu.VMEM((9 * C, Q), mxu_dtype)],      # im2col tile
        compiler_params=pltpu.CompilerParams(
            dimension_semantics=("parallel",),
            vmem_limit_bytes=32 * 1024 * 1024),
    )(xflat, w1t, b1, w2t, b2)

    # Drop the 2 junk columns per w row and realize torch's transpose(1,3).
    # (Output-sized only; consumers can use the (B, C, W, Hp) layout directly.)
    out = out.reshape(B, C, W, Hp)[:, :, :, :H]                # (B, C, W, H)
    return jnp.transpose(out, (0, 2, 3, 1))                    # (B, W, H, C)


def forward_ref(x_nchw, params):
    """Pure-JAX reference mirroring the PyTorch forward exactly (f32, unfused)."""
    dn = jax.lax.conv_dimension_numbers(
        x_nchw.shape, params["wsx"].shape, ("NCHW", "OIHW", "NCHW"))
    gx = jax.lax.conv_general_dilated(x_nchw, params["wsx"], (1, 1), "SAME",
                                      dimension_numbers=dn)
    gx = gx + params["bsx"][None, :, None, None]
    gy = jax.lax.conv_general_dilated(x_nchw, params["wsy"], (1, 1), "SAME",
                                      dimension_numbers=dn)
    gy = gy + params["bsy"][None, :, None, None]
    feat = jnp.concatenate([gx, gy, x_nchw], axis=1)            # (B, 48, H, W)
    feat = jnp.transpose(feat, (0, 3, 2, 1))                    # torch .transpose(1,3)
    h = jnp.maximum(feat @ params["w1"].T + params["b1"], 0.0)
    return h @ params["w2"].T + params["b2"]


def make_params(key, C=16, hidden=128):
    """Deterministic params with the shapes from NeuralCellularAutomata.__init__."""
    sobel = jnp.array([[-1., 0., 1.], [-2., 0., 2.], [-1., 0., 1.]],
                      dtype=jnp.float32) / 8.0
    wsx = jnp.tile(sobel, (C, C, 1, 1))                         # (16,16,3,3) OIHW
    wsy = jnp.tile(sobel.T, (C, C, 1, 1))
    k = jax.random.split(key, 5)
    bc = 1.0 / jnp.sqrt(C * 9.0)
    bsx = jax.random.uniform(k[0], (C,), jnp.float32, -bc, bc)
    bsy = jax.random.uniform(k[1], (C,), jnp.float32, -bc, bc)
    b1b = 1.0 / jnp.sqrt(3.0 * C)
    w1 = jax.random.uniform(k[2], (hidden, 3 * C), jnp.float32, -b1b, b1b)
    b1 = jax.random.uniform(k[3], (hidden,), jnp.float32, -b1b, b1b)
    # Faithful to the module: dense2.weight.data.zero_()
    w2 = jnp.zeros((C, hidden), jnp.float32)
    b2b = 1.0 / jnp.sqrt(float(hidden))
    b2 = jax.random.uniform(k[4], (C,), jnp.float32, -b2b, b2b)
    return dict(wsx=wsx, bsx=bsx, wsy=wsy, bsy=bsy, w1=w1, b1=b1, w2=w2, b2=b2)


if __name__ == "__main__":
    B, C, H, W = 2, 16, 16, 16          # the module hard-wires 16 channels
    key = jax.random.PRNGKey(0)
    kx, kp, kw2, kx2 = jax.random.split(key, 4)
    x = jax.random.normal(kx, (B, C, H, W), jnp.float32)
    params = make_params(kp, C=C)

    # Module-faithful run (dense2.weight == 0), f32 MXU operands -> tight check.
    ref = forward_ref(x, params)
    out = jax.block_until_ready(nca_forward(x, params, mxu_dtype=jnp.float32))
    assert out.shape == (B, W, H, C), out.shape
    assert jnp.allclose(out, ref, atol=1e-4, rtol=1e-4)

    # Non-zero dense2 weights exercise the second matmul path.
    params_nz = dict(params)
    params_nz["w2"] = 0.05 * jax.random.normal(kw2, (C, 128), jnp.float32)
    ref_nz = forward_ref(x, params_nz)
    out_nz = jax.block_until_ready(nca_forward(x, params_nz, mxu_dtype=jnp.float32))
    assert jnp.allclose(out_nz, ref_nz, atol=1e-4, rtol=1e-4)

    # Non-square spatial shape exercises the fused im2col index arithmetic.
    Hn, Wn = 12, 20
    x_ns = jax.random.normal(kx2, (B, C, Hn, Wn), jnp.float32)
    ref_ns = forward_ref(x_ns, params_nz)
    out_ns = jax.block_until_ready(nca_forward(x_ns, params_nz, mxu_dtype=jnp.float32))
    assert out_ns.shape == (B, Wn, Hn, C), out_ns.shape
    assert jnp.allclose(out_ns, ref_ns, atol=1e-4, rtol=1e-4)

    # Optional bf16 MXU operands (v6e / v7x); accumulation + bias/ReLU stay f32.
    # (Identity tap also rides the bf16 matmul -> keep f32 for many-step rollouts.)
    out_bf = jax.block_until_ready(nca_forward(x, params_nz, mxu_dtype=jnp.bfloat16))
    assert jnp.allclose(out_bf, ref_nz, atol=1e-1, rtol=1e-1)

    print("KERNEL_OK")
</pallas_src>

<mosaic_0001>
module attributes {stable_mosaic.version = 11 : i64} {
  func.func @_nca_kernel(%arg0: i32, %arg1: memref<1x16x342xf32, #tpu.memory_space<vmem>>, %arg2: memref<128x144xf32, #tpu.memory_space<vmem>>, %arg3: memref<128x1xf32, #tpu.memory_space<vmem>>, %arg4: memref<16x128xf32, #tpu.memory_space<vmem>>, %arg5: memref<16x1xf32, #tpu.memory_space<vmem>>, %arg6: memref<1x16x288xf32, #tpu.memory_space<vmem>>, %arg7: memref<144x288xf32, #tpu.memory_space<vmem>>) attributes {dimension_semantics = [#tpu.dimension_semantics<parallel>], iteration_bounds = array<i64: 2>, scalar_prefetch = 0 : i64, scratch_operands = 1 : i64, tpu.core_type = #tpu.core_type<tc>, window_params = [{transform_indices = @transform_0, window_bounds = array<i64: 1, 16, 342>}, {pipeline_mode = #tpu.pipeline_mode<synchronous>, transform_indices = @transform_1, window_bounds = array<i64: 128, 144>}, {pipeline_mode = #tpu.pipeline_mode<synchronous>, transform_indices = @transform_2, window_bounds = array<i64: 128, 1>}, {pipeline_mode = #tpu.pipeline_mode<synchronous>, transform_indices = @transform_3, window_bounds = array<i64: 16, 128>}, {pipeline_mode = #tpu.pipeline_mode<synchronous>, transform_indices = @transform_4, window_bounds = array<i64: 16, 1>}, {transform_indices = @transform_5, window_bounds = array<i64: 1, 16, 288>}]} {
    %c0 = arith.constant 0 : index
    %c0_0 = arith.constant 0 : index
    %c0_1 = arith.constant 0 : index
    %0 = vector.load %arg1[%c0, %c0_0, %c0_1] : memref<1x16x342xf32, #tpu.memory_space<vmem>>, vector<1x16x342xf32>
    %1 = vector.shape_cast %0 : vector<1x16x342xf32> to vector<16x342xf32>
    %2 = vector.extract_strided_slice %1 {offsets = [0, 0], sizes = [16, 288], strides = [1, 1]} : vector<16x342xf32> to vector<16x288xf32>
    %c0_2 = arith.constant 0 : index
    %c0_3 = arith.constant 0 : index
    %3 = vector.load %arg7[%c0_2, %c0_3] : memref<144x288xf32, #tpu.memory_space<vmem>>, vector<16x288xf32>
    tpu.vector_store %arg7[%c0_2, %c0_3], %2 {strides = array<i32>} : memref<144x288xf32, #tpu.memory_space<vmem>>, vector<16x288xf32>,
    %4 = vector.extract_strided_slice %1 {offsets = [0, 18], sizes = [16, 288], strides = [1, 1]} : vector<16x342xf32> to vector<16x288xf32>
    %c16 = arith.constant 16 : index
    %c0_4 = arith.constant 0 : index
    %5 = vector.load %arg7[%c16, %c0_4] : memref<144x288xf32, #tpu.memory_space<vmem>>, vector<16x288xf32>
    tpu.vector_store %arg7[%c16, %c0_4], %4 {strides = array<i32>} : memref<144x288xf32, #tpu.memory_space<vmem>>, vector<16x288xf32>,
    %6 = vector.extract_strided_slice %1 {offsets = [0, 36], sizes = [16, 288], strides = [1, 1]} : vector<16x342xf32> to vector<16x288xf32>
    %c32 = arith.constant 32 : index
    %c0_5 = arith.constant 0 : index
    %7 = vector.load %arg7[%c32, %c0_5] : memref<144x288xf32, #tpu.memory_space<vmem>>, vector<16x288xf32>
    tpu.vector_store %arg7[%c32, %c0_5], %6 {strides = array<i32>} : memref<144x288xf32, #tpu.memory_space<vmem>>, vector<16x288xf32>,
    %8 = vector.extract_strided_slice %1 {offsets = [0, 1], sizes = [16, 288], strides = [1, 1]} : vector<16x342xf32> to vector<16x288xf32>
    %c48 = arith.constant 48 : index
    %c0_6 = arith.constant 0 : index
    %9 = vector.load %arg7[%c48, %c0_6] : memref<144x288xf32, #tpu.memory_space<vmem>>, vector<16x288xf32>
    tpu.vector_store %arg7[%c48, %c0_6], %8 {strides = array<i32>} : memref<144x288xf32, #tpu.memory_space<vmem>>, vector<16x288xf32>,
    %10 = vector.extract_strided_slice %1 {offsets = [0, 19], sizes = [16, 288], strides = [1, 1]} : vector<16x342xf32> to vector<16x288xf32>
    %c64 = arith.constant 64 : index
    %c0_7 = arith.constant 0 : index
    %11 = vector.load %arg7[%c64, %c0_7] : memref<144x288xf32, #tpu.memory_space<vmem>>, vector<16x288xf32>
    tpu.vector_store %arg7[%c64, %c0_7], %10 {strides = array<i32>} : memref<144x288xf32, #tpu.memory_space<vmem>>, vector<16x288xf32>,
    %12 = vector.extract_strided_slice %1 {offsets = [0, 37], sizes = [16, 288], strides = [1, 1]} : vector<16x342xf32> to vector<16x288xf32>
    %c80 = arith.constant 80 : index
    %c0_8 = arith.constant 0 : index
    %13 = vector.load %arg7[%c80, %c0_8] : memref<144x288xf32, #tpu.memory_space<vmem>>, vector<16x288xf32>
    tpu.vector_store %arg7[%c80, %c0_8], %12 {strides = array<i32>} : memref<144x288xf32, #tpu.memory_space<vmem>>, vector<16x288xf32>,
    %14 = vector.extract_strided_slice %1 {offsets = [0, 2], sizes = [16, 288], strides = [1, 1]} : vector<16x342xf32> to vector<16x288xf32>
    %c96 = arith.constant 96 : index
    %c0_9 = arith.constant 0 : index
    %15 = vector.load %arg7[%c96, %c0_9] : memref<144x288xf32, #tpu.memory_space<vmem>>, vector<16x288xf32>
    tpu.vector_store %arg7[%c96, %c0_9], %14 {strides = array<i32>} : memref<144x288xf32, #tpu.memory_space<vmem>>, vector<16x288xf32>,
    %16 = vector.extract_strided_slice %1 {offsets = [0, 20], sizes = [16, 288], strides = [1, 1]} : vector<16x342xf32> to vector<16x288xf32>
    %c112 = arith.constant 112 : index
    %c0_10 = arith.constant 0 : index
    %17 = vector.load %arg7[%c112, %c0_10] : memref<144x288xf32, #tpu.memory_space<vmem>>, vector<16x288xf32>
    tpu.vector_store %arg7[%c112, %c0_10], %16 {strides = array<i32>} : memref<144x288xf32, #tpu.memory_space<vmem>>, vector<16x288xf32>,
    %18 = vector.extract_strided_slice %1 {offsets = [0, 38], sizes = [16, 288], strides = [1, 1]} : vector<16x342xf32> to vector<16x288xf32>
    %c128 = arith.constant 128 : index
    %c0_11 = arith.constant 0 : index
    %19 = vector.load %arg7[%c128, %c0_11] : memref<144x288xf32, #tpu.memory_space<vmem>>, vector<16x288xf32>
    tpu.vector_store %arg7[%c128, %c0_11], %18 {strides = array<i32>} : memref<144x288xf32, #tpu.memory_space<vmem>>, vector<16x288xf32>,
    %c0_12 = arith.constant 0 : index
    %c0_13 = arith.constant 0 : index
    %20 = vector.load %arg2[%c0_12, %c0_13] : memref<128x144xf32, #tpu.memory_space<vmem>>, vector<128x144xf32>
    %c0_14 = arith.constant 0 : index
    %c0_15 = arith.constant 0 : index
    %21 = vector.load %arg7[%c0_14, %c0_15] : memref<144x288xf32, #tpu.memory_space<vmem>>, vector<144x288xf32>
    %cst = arith.constant dense<0.000000e+00> : vector<128x288xf32>
    %22 = tpu.matmul %20, %21, %cst {dimension_numbers = #tpu.dot_dimension_numbers<[1], [0], [0], [1], [0, 0, 1, 1], [], []>} : vector<128x144xf32>, vector<144x288xf32>, vector<128x288xf32> -> vector<128x288xf32>
    %c0_16 = arith.constant 0 : index
    %c0_17 = arith.constant 0 : index
    %23 = vector.load %arg3[%c0_16, %c0_17] : memref<128x1xf32, #tpu.memory_space<vmem>>, vector<128x1xf32>
    %24 = vector.broadcast %23 : vector<128x1xf32> to vector<128x288xf32>
    %25 = arith.addf %22, %24 : vector<128x288xf32>
    %cst_18 = arith.constant 0.000000e+00 : f32
    %26 = vector.broadcast %cst_18 : f32 to vector<128x288xf32>
    %27 = arith.maximumf %25, %26 : vector<128x288xf32>
    %c0_19 = arith.constant 0 : index
    %c0_20 = arith.constant 0 : index
    %28 = vector.load %arg4[%c0_19, %c0_20] : memref<16x128xf32, #tpu.memory_space<vmem>>, vector<16x128xf32>
    %cst_21 = arith.constant dense<0.000000e+00> : vector<16x288xf32>
    %29 = tpu.matmul %28, %27, %cst_21 {dimension_numbers = #tpu.dot_dimension_numbers<[1], [0], [0], [1], [0, 0, 1, 1], [], []>} : vector<16x128xf32>, vector<128x288xf32>, vector<16x288xf32> -> vector<16x288xf32>
    %c0_22 = arith.constant 0 : index
    %c0_23 = arith.constant 0 : index
    %30 = vector.load %arg5[%c0_22, %c0_23] : memref<16x1xf32, #tpu.memory_space<vmem>>, vector<16x1xf32>
    %31 = vector.broadcast %30 : vector<16x1xf32> to vector<16x288xf32>
    %32 = arith.addf %29, %31 : vector<16x288xf32>
    %c0_24 = arith.constant 0 : index
    %c0_25 = arith.constant 0 : index
    %c0_26 = arith.constant 0 : index
    %33 = vector.load %arg6[%c0_24, %c0_25, %c0_26] : memref<1x16x288xf32, #tpu.memory_space<vmem>>, vector<1x16x288xf32>
    %34 = vector.shape_cast %33 : vector<1x16x288xf32> to vector<16x288xf32>
    %35 = vector.shape_cast %32 : vector<16x288xf32> to vector<1x16x288xf32>
    tpu.vector_store %arg6[%c0_24, %c0_25, %c0_26], %35 {strides = array<i32>} : memref<1x16x288xf32, #tpu.memory_space<vmem>>, vector<1x16x288xf32>,
    return
  }
  func.func @transform_0(%arg0: i32) -> (i32, i32, i32) {
    %c0_i32 = arith.constant 0 : i32
    %c0_i32_0 = arith.constant 0 : i32
    %c0_i32_1 = arith.constant 0 : i32
    return %arg0, %c0_i32, %c0_i32_0 : i32, i32, i32
  }
  func.func @transform_1(%arg0: i32) -> (i32, i32) {
    %c0_i32 = arith.constant 0 : i32
    %c0_i32_0 = arith.constant 0 : i32
    %c0_i32_1 = arith.constant 0 : i32
    return %c0_i32, %c0_i32_0 : i32, i32
  }
  func.func @transform_2(%arg0: i32) -> (i32, i32) {
    %c0_i32 = arith.constant 0 : i32
    %c0_i32_0 = arith.constant 0 : i32
    %c0_i32_1 = arith.constant 0 : i32
    return %c0_i32, %c0_i32_0 : i32, i32
  }
  func.func @transform_3(%arg0: i32) -> (i32, i32) {
    %c0_i32 = arith.constant 0 : i32
    %c0_i32_0 = arith.constant 0 : i32
    %c0_i32_1 = arith.constant 0 : i32
    return %c0_i32, %c0_i32_0 : i32, i32
  }
  func.func @transform_4(%arg0: i32) -> (i32, i32) {
    %c0_i32 = arith.constant 0 : i32
    %c0_i32_0 = arith.constant 0 : i32
    %c0_i32_1 = arith.constant 0 : i32
    return %c0_i32, %c0_i32_0 : i32, i32
  }
  func.func @transform_5(%arg0: i32) -> (i32, i32, i32) {
    %c0_i32 = arith.constant 0 : i32
    %c0_i32_0 = arith.constant 0 : i32
    %c0_i32_1 = arith.constant 0 : i32
    return %arg0, %c0_i32, %c0_i32_0 : i32, i32, i32
  }
}

</mosaic_0001>

<bundles_post_ra>
// kernel: nca_forward.1
= control target key start
LH: loop header
LB: loop body
LE: loop exit
PB: predicated region body
PF: predicated region fallthrough
CT: control target
= control target key end

     0   :  { %s1580_s18 = smov 0   ;;  %s1910_s0 = inlined_call_operand.vmem [shape: f32[2,16,342], index: 0, kind: input, shape index: {}]   ;;  %s1911_s1 = inlined_call_operand.vmem [shape: f32[128,144], index: 1, kind: input, shape index: {}]   ;;  %s1912_s2 = inlined_call_operand.vmem [shape: f32[128,1], index: 2, kind: input, shape index: {}]   ;;  %s1913_s3 = inlined_call_operand.vmem [shape: f32[16,128], index: 3, kind: input, shape index: {}]   ;;  %s1914_s4 = inlined_call_operand.vmem [shape: f32[16,1], index: 4, kind: input, shape index: {}]   ;;  %s1915_s5 = inlined_call_operand.vmem [shape: f32[2,16,288], index: 5, kind: output, shape index: {}]  }
   0x1 LB: > { %s1288_s19 = sadd.s32 4294967295, %s1537_s18   ;;  %p1292_p0 = scmp.ge.s32.totalorder %s1537_s18, 1  ;;  %s1537_s18 = sphi %s1580_s18, %s15_s18  }
   0x2   : > { %p187_p1 = scmp.lt.s32.totalorder %s1537_s18, 3 }
   0x4   : > { %p188_p2 = pnand %p1292_p0, %p187_p1 }
   0x5   : > { %p215_p3 = scmp.lt.s32.totalorder (!%p188_p2), %s1288_s19, 1  ;;  %v1539_v0 = vmov (!%p188_p2), 0.0|0.0   ;;  %vm233_vm0 = vcmask (!%p188_p2), 261120   ;;  %s1540_s24 = smov (!%p188_p2), 110   ;;  %v477_v12 = vld [vmem:[%s1911_s1 + $0x8] sm:$0xff] (!%p188_p2)  ;;  %vm658_vm1 = vcmask (!%p188_p2), 130048  }
   0x6   : > { %191 = sbr.rel (%p188_p2) target bundleno = 734 (0x2de), region = 40  ;;  %1418 = vmatprep.subr.bf16.mxu1 (!%p188_p2), %v1539_v0  ;;  %s1541_s25 = smov (!%p188_p2), 92   ;;  %1311 = vmatprep.mubr.msk.f32.mxu1 (!%p188_p2), %vm658_vm1, %v477_v12  ;;  %vm256_vm2 = vcmask (!%p188_p2), 900096   ;;  %vm285_vm3 = vcmask (!%p188_p2), 752640   ;;  %vm314_vm4 = vcmask (!%p188_p2), 1039360   ;;  %vm343_vm5 = vcmask (!%p188_p2), 891904  }
   0x7   : > { %s1542_s26 = smov (!%p188_p2), 127   ;;  %s1543_s27 = smov (!%p188_p2), 109   ;;  %1295 = vmatprep.mubr.msk.f32.mxu0 (!%p188_p2), %vm658_vm1, %v477_v12  ;;  %v563_v55 = vld [vmem:[%s1912_s2 + $0x8] sm:$0xff] (!%p188_p2)  ;;  %v562_v56 = vld [vmem:[%s1912_s2] sm:$0xff] (!%p188_p2)  ;;  %v1548_v57 = vmov (!%p188_p2), 0   ;;  %vm372_vm6 = vcmask (!%p188_p2), 744448  }
   0x8   : > { %s1544_s28 = smov (!%p188_p2), 91   ;;  %s1545_s29 = smov (!%p188_p2), 126   ;;  %1530 = vset.pattern.permute.xlu1 (!%p188_p2), %v1548_v57  ;;  %1529 = vset.pattern.permute.xlu0 (!%p188_p2), %v1548_v57  ;;  %vm401_vm7 = vcmask (!%p188_p2), 1031168   ;;  %vm430_vm8 = vcmask (!%p188_p2), 883712   ;;  %vm459_vm9 = vcmask (!%p188_p2), 736256  }
   0x9   : > { %s1546_s30 = smov (!%p188_p2), 108   ;;  %s1547_s8 = smov (!%p188_p2), 90  }
   0xd   : > { %s1917_s19 = smov (!%p215_p3, %s1288_s19), 1 }
   0xe   : > { %s1509_s20 = smul.u32 48, %s1917_s19 }
  0x10   : > { %s219_s23 = scalar_lea.vmem %s1910_s0, %s1509_s20 }
  0x11   : > { %v1597_v1 = vld [vmem:[%s219_s23 + $0x20] sm:$0xff]  ;;  %v1599_v2 = vld [vmem:[%s219_s23 + $0x8] sm:$0xff]  ;;  %v227_v4 = vld [vmem:[%s219_s23 + $0x10] sm:$0xff] }
  0x12   : > { %v1601_v3 = vld [vmem:[%s219_s23 + $0x28] sm:$0xff]  ;;  %252 = vrot.lane.b32.xlu1 %v1597_v1, %s1540_s24  ;;  %246 = vrot.lane.b32.xlu0 %v1599_v2, %s1540_s24  ;;  %v1605_v5 = vld [vmem:[%s219_s23 + $0x18] sm:$0xff]  ;;  %v1382_v6 = vpack.c.bf16 %v1597_v1, %v1599_v2  ;;  %234 = vst.msk [vmem:[#allocation2 + $0x10] sm:$0xff] %vm233_vm0, %v227_v4 }
  0x13   : > { %237 = vst.msk [vmem:[#allocation2 + $0x28] sm:$0xff] %vm233_vm0, %v1601_v3  ;;  %v1611_v7 = vld [vmem:[%s219_s23] sm:$0xff] }
  0x14   : > { %1383 = vmatprep.subr.bf16.mxu0 %v1382_v6  ;;  %v1384_v8 = vpack.c.bf16 %v1605_v5, %v1611_v7  ;;  %v566_v6 = vld [vmem:[%s1912_s2 + $0x20] sm:$0xff] }
  0x16   : > { %254 = vrot.lane.b32.xlu1 %v1601_v3, %s1540_s24  ;;  %248 = vrot.lane.b32.xlu0 %v227_v4, %s1540_s24 }
  0x17   : > { %1385 = vmatpush1.bf16.msra.mxu0 %v1384_v8  ;;  %v567_v8 = vld [vmem:[%s1912_s2 + $0x28] sm:$0xff] }
  0x19   : > { %v510_v10 = vld [vmem:[#allocation2 + $0x10] sm:$0xff] }
  0x1a   : > { %v513_v9 = vld [vmem:[#allocation2 + $0x28] sm:$0xff]  ;;  %250 = vrot.lane.b32.xlu1 %v1605_v5, %s1540_s24  ;;  %244 = vrot.lane.b32.xlu0 %v1611_v7, %s1540_s24 }
  0x1b   : > { %v1419_v11 = vpack.c.bf16 %v513_v9, %v510_v10 }
  0x1d   : > { %1420 = vmatpush1.bf16.msra.mxu1 %v1419_v11 }
  0x1e   : > { %277 = vrot.lane.b32.xlu1 %v227_v4, %s1541_s25  ;;  %275 = vrot.lane.b32.xlu0 %v1599_v2, %s1541_s25 }
  0x1f   : > { %1421 = vmatprep.subr.bf16.mxu1 %v1539_v0 }
  0x22   : > { %283 = vrot.lane.b32.xlu1 %v1601_v3, %s1541_s25  ;;  %281 = vrot.lane.b32.xlu0 %v1597_v1, %s1541_s25 }
  0x26   : > { %279 = vrot.lane.b32.xlu1 %v1605_v5, %s1541_s25  ;;  %273 = vrot.lane.b32.xlu0 %v1611_v7, %s1541_s25 }
  0x2a   : > { %306 = vrot.lane.b32.xlu1 %v227_v4, %s1542_s26  ;;  %304 = vrot.lane.b32.xlu0 %v1599_v2, %s1542_s26 }
  0x2e   : > { %312 = vrot.lane.b32.xlu1 %v1601_v3, %s1542_s26  ;;  %310 = vrot.lane.b32.xlu0 %v1597_v1, %s1542_s26 }
  0x32   : > { %308 = vrot.lane.b32.xlu1 %v1605_v5, %s1542_s26  ;;  %302 = vrot.lane.b32.xlu0 %v1611_v7, %s1542_s26 }
  0x36   : > { %335 = vrot.lane.b32.xlu1 %v227_v4, %s1543_s27  ;;  %333 = vrot.lane.b32.xlu0 %v1599_v2, %s1543_s27 }
  0x3a   : > { %341 = vrot.lane.b32.xlu1 %v1601_v3, %s1543_s27  ;;  %339 = vrot.lane.b32.xlu0 %v1597_v1, %s1543_s27 }
  0x3e   : > { %337 = vrot.lane.b32.xlu1 %v1605_v5, %s1543_s27  ;;  %331 = vrot.lane.b32.xlu0 %v1611_v7, %s1543_s27 }
  0x42   : > { %364 = vrot.lane.b32.xlu1 %v227_v4, %s1544_s28  ;;  %362 = vrot.lane.b32.xlu0 %v1599_v2, %s1544_s28 }
  0x46   : > { %370 = vrot.lane.b32.xlu1 %v1601_v3, %s1544_s28  ;;  %368 = vrot.lane.b32.xlu0 %v1597_v1, %s1544_s28 }
  0x4a   : > { %366 = vrot.lane.b32.xlu1 %v1605_v5, %s1544_s28  ;;  %360 = vrot.lane.b32.xlu0 %v1611_v7, %s1544_s28  ;;  %s224_s28 = scalar_lea.vmem %s1915_s5, %s1509_s20 }
  0x4e   : > { %393 = vrot.lane.b32.xlu1 %v227_v4, %s1545_s29  ;;  %391 = vrot.lane.b32.xlu0 %v1599_v2, %s1545_s29 }
  0x52   : > { %399 = vrot.lane.b32.xlu1 %v1601_v3, %s1545_s29  ;;  %397 = vrot.lane.b32.xlu0 %v1597_v1, %s1545_s29 }
  0x56   : > { %395 = vrot.lane.b32.xlu1 %v1605_v5, %s1545_s29  ;;  %389 = vrot.lane.b32.xlu0 %v1611_v7, %s1545_s29 }
  0x5a   : > { %422 = vrot.lane.b32.xlu1 %v227_v4, %s1546_s30  ;;  %420 = vrot.lane.b32.xlu0 %v1599_v2, %s1546_s30 }
  0x5e   : > { %428 = vrot.lane.b32.xlu1 %v1601_v3, %s1546_s30  ;;  %426 = vrot.lane.b32.xlu0 %v1597_v1, %s1546_s30 }
  0x62   : > { %424 = vrot.lane.b32.xlu1 %v1605_v5, %s1546_s30  ;;  %418 = vrot.lane.b32.xlu0 %v1611_v7, %s1546_s30 }
  0x66   : > { %451 = vrot.lane.b32.xlu1 %v227_v4, %s1547_s8  ;;  %449 = vrot.lane.b32.xlu0 %v1599_v2, %s1547_s8  ;;  %v565_v2 = vld [vmem:[%s1912_s2 + $0x18] sm:$0xff] }
  0x6a   : > { %457 = vrot.lane.b32.xlu1 %v1601_v3, %s1547_s8  ;;  %455 = vrot.lane.b32.xlu0 %v1597_v1, %s1547_s8  ;;  %v564_v1 = vld [vmem:[%s1912_s2 + $0x10] sm:$0xff] }
  0x6e   : > { %453 = vrot.lane.b32.xlu1 %v1605_v5, %s1547_s8  ;;  %447 = vrot.lane.b32.xlu0 %v1611_v7, %s1547_s8 }
  0x72   : > { %585 = vperm.xlu1 %1530, %v563_v55   ;;  %580 = vperm.xlu0 %1529, %v562_v56  }
  0x76   : > { %590 = vperm.xlu1 %1530, %v564_v1   ;;  %595 = vperm.xlu0 %1529, %v565_v2  }
  0x7a   : > { %600 = vperm.xlu1 %1530, %v566_v6   ;;  %605 = vperm.xlu0 %1529, %v567_v8  }
  0x84   : > { %v253_v13 = vpop.permute.xlu1 %252  ;;  %v247_v14 = vpop.permute.xlu0 %246 }
  0x88   : > { %v255_v15 = vpop.permute.xlu1 %254  ;;  %v249_v16 = vpop.permute.xlu0 %248 }
  0x89   : > { %v260_v17 = vsel %vm256_vm2, %v253_v13, %v255_v15  ;;  %272 = vst.msk [vmem:[#allocation2 + $0x58] sm:$0xff] %vm233_vm0, %v255_v15  ;;  %v258_v18 = vsel %vm256_vm2, %v247_v14, %v249_v16  ;;  %269 = vst.msk [vmem:[#allocation2 + $0x40] sm:$0xff] %vm233_vm0, %v249_v16  ;;  %v569_v15 = vld [vmem:[%s1912_s2 + $0x38] sm:$0xff] }
  0x8a   : > { %v1386_v19 = vpack.c.bf16 %v260_v17, %v258_v18  ;;  %615 = vperm.xlu0 %1529, %v569_v15  }
  0x8c   : > { %v251_v20 = vpop.permute.xlu1 %250  ;;  %v245_v21 = vpop.permute.xlu0 %244  ;;  %1387 = vmatprep.subr.bf16.mxu0 %v1386_v19 }
  0x8d   : > { %v259_v22 = vsel %vm256_vm2, %v251_v20, %v253_v13  ;;  %v257_v23 = vsel %vm256_vm2, %v245_v21, %v247_v14  ;;  %v568_v13 = vld [vmem:[%s1912_s2 + $0x30] sm:$0xff] }
  0x8e   : > { %v1388_v24 = vpack.c.bf16 %v259_v22, %v257_v23  ;;  %610 = vperm.xlu1 %1530, %v568_v13   ;;  %v570_v22 = vld [vmem:[%s1912_s2 + $0x40] sm:$0xff]  ;;  %v571_v23 = vld [vmem:[%s1912_s2 + $0x48] sm:$0xff] }
  0x8f   : > { %625 = vperm.xlu0 %1529, %v571_v23  }
  0x90   : > { %v278_v25 = vpop.permute.xlu1 %277  ;;  %v276_v26 = vpop.permute.xlu0 %275  ;;  %v516_v27 = vld [vmem:[#allocation2 + $0x40] sm:$0xff]  ;;  %v519_v28 = vld [vmem:[#allocation2 + $0x58] sm:$0xff]  ;;  %1389 = vmatpush1.bf16.msra.mxu0 %v1388_v24 }
  0x91   : > { %298 = vst.msk [vmem:[#allocation2 + $0x70] sm:$0xff] %vm233_vm0, %v278_v25  ;;  %v287_v29 = vsel %vm285_vm3, %v276_v26, %v278_v25  ;;  %v1422_v30 = vpack.c.bf16 %v519_v28, %v516_v27  ;;  %v572_v27 = vld [vmem:[%s1912_s2 + $0x50] sm:$0xff] }
  0x92   : > { %620 = vperm.xlu1 %1530, %v570_v22  }
  0x93   : > { %1423 = vmatpush1.bf16.msra.mxu1 %v1422_v30 }
  0x94   : > { %v284_v31 = vpop.permute.xlu1 %283  ;;  %v282_v32 = vpop.permute.xlu0 %281  ;;  %1424 = vmatprep.subr.bf16.mxu1 %v1539_v0 }
  0x95   : > { %301 = vst.msk [vmem:[#allocation2 + $0x88] sm:$0xff] %vm233_vm0, %v284_v31  ;;  %v289_v33 = vsel %vm285_vm3, %v282_v32, %v284_v31 }
  0x96   : > { %v1390_v34 = vpack.c.bf16 %v289_v33, %v287_v29  ;;  %v573_v29 = vld [vmem:[%s1912_s2 + $0x58] sm:$0xff]  ;;  %630 = vperm.xlu1 %1530, %v572_v27   ;;  %v478_v27 = vld [vmem:[%s1911_s1 + $0x10] sm:$0xff] }
  0x97   : > { %635 = vperm.xlu0 %1529, %v573_v29   ;;  %v480_v29 = vld [vmem:[%s1911_s1 + $0x20] sm:$0xff] }
  0x98   : > { %v280_v35 = vpop.permute.xlu1 %279  ;;  %v274_v36 = vpop.permute.xlu0 %273  ;;  %1391 = vmatprep.subr.bf16.mxu0 %v1390_v34  ;;  %v522_v42 = vld [vmem:[#allocation2 + $0x70] sm:$0xff]  ;;  %v574_v34 = vld [vmem:[%s1912_s2 + $0x60] sm:$0xff] }
  0x99   : > { %v288_v37 = vsel %vm285_vm3, %v280_v35, %v282_v32  ;;  %v286_v38 = vsel %vm285_vm3, %v274_v36, %v276_v26  ;;  %v575_v36 = vld [vmem:[%s1912_s2 + $0x68] sm:$0xff] }
  0x9a   : > { %v1392_v39 = vpack.c.bf16 %v288_v37, %v286_v38  ;;  %640 = vperm.xlu1 %1530, %v574_v34   ;;  %v487_v34 = vld [vmem:[%s1911_s1 + $0x58] sm:$0xff] }
  0x9b   : > { %645 = vperm.xlu0 %1529, %v575_v36   ;;  %v489_v36 = vld [vmem:[%s1911_s1 + $0x68] sm:$0xff] }
  0x9c   : > { %v307_v40 = vpop.permute.xlu1 %306  ;;  %v305_v41 = vpop.permute.xlu0 %304  ;;  %v525_v43 = vld [vmem:[#allocation2 + $0x88] sm:$0xff]  ;;  %1393 = vmatpush1.bf16.msra.mxu0 %v1392_v39 }
  0x9d   : > { %327 = vst.msk [vmem:[#allocation2 + $0xa0] sm:$0xff] %vm233_vm0, %v307_v40  ;;  %v316_v44 = vsel %vm314_vm4, %v305_v41, %v307_v40  ;;  %v1425_v45 = vpack.c.bf16 %v525_v43, %v522_v42  ;;  %v576_v43 = vld [vmem:[%s1912_s2 + $0x70] sm:$0xff] }
  0x9e   : > { %650 = vperm.xlu1 %1530, %v576_v43   ;;  %v494_v43 = vld [vmem:[%s1911_s1 + $0x90] sm:$0xff] }
  0x9f   : > { %1426 = vmatpush1.bf16.msra.mxu1 %v1425_v45 }
  0xa0   : > { %v313_v46 = vpop.permute.xlu1 %312  ;;  %v311_v47 = vpop.permute.xlu0 %310  ;;  %1427 = vmatprep.subr.bf16.mxu1 %v1539_v0 }
  0xa1   : > { %330 = vst.msk [vmem:[#allocation2 + $0xb8] sm:$0xff] %vm233_vm0, %v313_v46  ;;  %v318_v48 = vsel %vm314_vm4, %v311_v47, %v313_v46 }
  0xa2   : > { %v1394_v49 = vpack.c.bf16 %v318_v48, %v316_v44  ;;  %v577_v44 = vld [vmem:[%s1912_s2 + $0x78] sm:$0xff]  ;;  %v1063_v48 = vld [vmem:[%s1914_s4] sm:$0xff] }
  0xa3   : > { %655 = vperm.xlu0 %1529, %v577_v44   ;;  %1067 = vperm.xlu1 %1530, %v1063_v48   ;;  %v497_v44 = vld [vmem:[%s1911_s1 + $0xa8] sm:$0xff] }
  0xa4   : > { %v309_v50 = vpop.permute.xlu1 %308  ;;  %v303_v51 = vpop.permute.xlu0 %302  ;;  %1395 = vmatprep.subr.bf16.mxu0 %v1394_v49  ;;  %v528_v60 = vld [vmem:[#allocation2 + $0xa0] sm:$0xff]  ;;  %v501_v48 = vld [vmem:[%s1911_s1 + $0xc8] sm:$0xff] }
  0xa5   : > { %v317_v52 = vsel %vm314_vm4, %v309_v50, %v311_v47  ;;  %v315_v53 = vsel %vm314_vm4, %v303_v51, %v305_v41  ;;  %v1064_v50 = vld [vmem:[%s1914_s4 + $0x8] sm:$0xff] }
  0xa6   : > { %v1396_v54 = vpack.c.bf16 %v317_v52, %v315_v53 }
  0xa7   : > { %1072 = vperm.xlu0 %1529, %v1064_v50   ;;  %v503_v50 = vld [vmem:[%s1911_s1 + $0xd8] sm:$0xff] }
  0xa8   : > { %v336_v58 = vpop.permute.xlu1 %335  ;;  %v334_v59 = vpop.permute.xlu0 %333  ;;  %v531_v61 = vld [vmem:[#allocation2 + $0xb8] sm:$0xff]  ;;  %1397 = vmatpush1.bf16.msra.mxu0 %v1396_v54 }
  0xa9   : > { %356 = vst.msk [vmem:[#allocation2 + $0xd0] sm:$0xff] %vm233_vm0, %v336_v58  ;;  %v345_v62 = vsel %vm343_vm5, %v334_v59, %v336_v58  ;;  %v1428_v63 = vpack.c.bf16 %v531_v61, %v528_v60 }
  0xab   : > { %1429 = vmatpush1.bf16.msra.mxu1 %v1428_v63 }
  0xac   : > { %v342_v3 = vpop.permute.xlu1 %341  ;;  %v340_v4 = vpop.permute.xlu0 %339  ;;  %1430 = vmatprep.subr.bf16.mxu1 %v1539_v0 }
  0xad   : > { %359 = vst.msk [vmem:[#allocation2 + $0xe8] sm:$0xff] %vm233_vm0, %v342_v3  ;;  %v347_v5 = vsel %vm343_vm5, %v340_v4, %v342_v3 }
  0xae   : > { %v1398_v7 = vpack.c.bf16 %v347_v5, %v345_v62 }
  0xb0   : > { %v338_v9 = vpop.permute.xlu1 %337  ;;  %v332_v10 = vpop.permute.xlu0 %331  ;;  %1399 = vmatprep.subr.bf16.mxu0 %v1398_v7  ;;  %v534_v18 = vld [vmem:[#allocation2 + $0xd0] sm:$0xff] }
  0xb1   : > { %v346_v11 = vsel %vm343_vm5, %v338_v9, %v340_v4  ;;  %v344_v12 = vsel %vm343_vm5, %v332_v10, %v334_v59 }
  0xb2   : > { %v1400_v14 = vpack.c.bf16 %v346_v11, %v344_v12 }
  0xb4   : > { %v365_v16 = vpop.permute.xlu1 %364  ;;  %v363_v17 = vpop.permute.xlu0 %362  ;;  %v537_v19 = vld [vmem:[#allocation2 + $0xe8] sm:$0xff]  ;;  %1401 = vmatpush1.bf16.msra.mxu0 %v1400_v14 }
  0xb5   : > { %385 = vst.msk [vmem:[#allocation2 + $0x100] sm:$0xff] %vm233_vm0, %v365_v16  ;;  %v374_v20 = vsel %vm372_vm6, %v363_v17, %v365_v16  ;;  %v1431_v21 = vpack.c.bf16 %v537_v19, %v534_v18 }
  0xb7   : > { %1432 = vmatpush1.bf16.msra.mxu1 %v1431_v21 }
  0xb8   : > { %v371_v24 = vpop.permute.xlu1 %370  ;;  %v369_v25 = vpop.permute.xlu0 %368  ;;  %1433 = vmatprep.subr.bf16.mxu1 %v1539_v0 }
  0xb9   : > { %388 = vst.msk [vmem:[#allocation2 + $0x118] sm:$0xff] %vm233_vm0, %v371_v24  ;;  %v376_v26 = vsel %vm372_vm6, %v369_v25, %v371_v24 }
  0xba   : > { %v1402_v28 = vpack.c.bf16 %v376_v26, %v374_v20  ;;  %v479_v26 = vld [vmem:[%s1911_s1 + $0x18] sm:$0xff] }
  0xbc   : > { %v367_v30 = vpop.permute.xlu1 %366  ;;  %v361_v31 = vpop.permute.xlu0 %360  ;;  %1403 = vmatprep.subr.bf16.mxu0 %v1402_v28  ;;  %v540_v39 = vld [vmem:[#allocation2 + $0x100] sm:$0xff]  ;;  %v481_v28 = vld [vmem:[%s1911_s1 + $0x28] sm:$0xff] }
  0xbd   : > { %v375_v32 = vsel %vm372_vm6, %v367_v30, %v369_v25  ;;  %v373_v33 = vsel %vm372_vm6, %v361_v31, %v363_v17  ;;  %v476_v25 = vld [vmem:[%s1911_s1] sm:$0xff]  ;;  %v483_v30 = vld [vmem:[%s1911_s1 + $0x38] sm:$0xff]  ;;  %v482_v31 = vld [vmem:[%s1911_s1 + $0x30] sm:$0xff] }
  0xbe   : > { %v1404_v35 = vpack.c.bf16 %v375_v32, %v373_v33  ;;  %v485_v32 = vld [vmem:[%s1911_s1 + $0x48] sm:$0xff]  ;;  %v484_v33 = vld [vmem:[%s1911_s1 + $0x40] sm:$0xff] }
  0xc0   : > { %v394_v37 = vpop.permute.xlu1 %393  ;;  %v392_v38 = vpop.permute.xlu0 %391  ;;  %v543_v40 = vld [vmem:[#allocation2 + $0x118] sm:$0xff]  ;;  %1405 = vmatpush1.bf16.msra.mxu0 %v1404_v35  ;;  %v486_v35 = vld [vmem:[%s1911_s1 + $0x50] sm:$0xff] }
  0xc1   : > { %414 = vst.msk [vmem:[#allocation2 + $0x130] sm:$0xff] %vm233_vm0, %v394_v37  ;;  %v403_v41 = vsel %vm401_vm7, %v392_v38, %v394_v37  ;;  %v1434_v42 = vpack.c.bf16 %v543_v40, %v540_v39  ;;  %v488_v37 = vld [vmem:[%s1911_s1 + $0x60] sm:$0xff]  ;;  %v490_v39 = vld [vmem:[%s1911_s1 + $0x70] sm:$0xff]  ;;  %v493_v40 = vld [vmem:[%s1911_s1 + $0x88] sm:$0xff] }
  0xc3   : > { %1435 = vmatpush1.bf16.msra.mxu1 %v1434_v42  ;;  %v495_v42 = vld [vmem:[%s1911_s1 + $0x98] sm:$0xff] }
  0xc4   : > { %v400_v45 = vpop.permute.xlu1 %399  ;;  %v398_v46 = vpop.permute.xlu0 %397  ;;  %1436 = vmatprep.subr.bf16.mxu1 %v1539_v0 }
  0xc5   : > { %417 = vst.msk [vmem:[#allocation2 + $0x148] sm:$0xff] %vm233_vm0, %v400_v45  ;;  %v405_v47 = vsel %vm401_vm7, %v398_v46, %v400_v45  ;;  %v496_v45 = vld [vmem:[%s1911_s1 + $0xa0] sm:$0xff] }
  0xc6   : > { %v1406_v49 = vpack.c.bf16 %v405_v47, %v403_v41  ;;  %v492_v41 = vld [vmem:[%s1911_s1 + $0x80] sm:$0xff]  ;;  %v498_v47 = vld [vmem:[%s1911_s1 + $0xb0] sm:$0xff] }
  0xc8   : > { %v396_v51 = vpop.permute.xlu1 %395  ;;  %v390_v52 = vpop.permute.xlu0 %389  ;;  %1407 = vmatprep.subr.bf16.mxu0 %v1406_v49  ;;  %v546_v58 = vld [vmem:[#allocation2 + $0x130] sm:$0xff]  ;;  %v500_v49 = vld [vmem:[%s1911_s1 + $0xc0] sm:$0xff] }
  0xc9   : > { %v404_v53 = vsel %vm401_vm7, %v396_v51, %v398_v46  ;;  %v402_v54 = vsel %vm401_vm7, %v390_v52, %v392_v38  ;;  %v491_v38 = vld [vmem:[%s1911_s1 + $0x78] sm:$0xff]  ;;  %v502_v51 = vld [vmem:[%s1911_s1 + $0xd0] sm:$0xff]  ;;  %v505_v52 = vld [vmem:[%s1911_s1 + $0xe8] sm:$0xff] }
  0xca   : > { %v1408_v55 = vpack.c.bf16 %v404_v53, %v402_v54  ;;  %v499_v46 = vld [vmem:[%s1911_s1 + $0xb8] sm:$0xff]  ;;  %v504_v53 = vld [vmem:[%s1911_s1 + $0xe0] sm:$0xff] }
  0xcb   : > { %v507_v54 = vld [vmem:[%s1911_s1 + $0xf8] sm:$0xff] }
  0xcc   : > { %v423_v56 = vpop.permute.xlu1 %422  ;;  %v421_v57 = vpop.permute.xlu0 %420  ;;  %v549_v59 = vld [vmem:[#allocation2 + $0x148] sm:$0xff]  ;;  %1409 = vmatpush1.bf16.msra.mxu0 %v1408_v55  ;;  %v506_v55 = vld [vmem:[%s1911_s1 + $0xf0] sm:$0xff] }
  0xcd   : > { %443 = vst.msk [vmem:[#allocation2 + $0x160] sm:$0xff] %vm233_vm0, %v423_v56  ;;  %v432_v60 = vsel %vm430_vm8, %v421_v57, %v423_v56  ;;  %v1437_v61 = vpack.c.bf16 %v549_v59, %v546_v58  ;;  %v1891_v56 = vld [vmem:[%s1913_s3] sm:$0xff] }
  0xcf   : > { %1438 = vmatpush1.bf16.msra.mxu1 %v1437_v61 }
  0xd0   : > { %v429_v62 = vpop.permute.xlu1 %428  ;;  %v427_v63 = vpop.permute.xlu0 %426  ;;  %1439 = vmatprep.subr.bf16.mxu1 %v1539_v0 }
  0xd1   : > { %446 = vst.msk [vmem:[#allocation2 + $0x178] sm:$0xff] %vm233_vm0, %v429_v62  ;;  %v434_v1 = vsel %vm430_vm8, %v427_v63, %v429_v62 }
  0xd2   : > { %v1410_v2 = vpack.c.bf16 %v434_v1, %v432_v60 }
  0xd4   : > { %v425_v3 = vpop.permute.xlu1 %424  ;;  %v419_v4 = vpop.permute.xlu0 %418  ;;  %1411 = vmatprep.subr.bf16.mxu0 %v1410_v2  ;;  %v552_v10 = vld [vmem:[#allocation2 + $0x160] sm:$0xff] }
  0xd5   : > { %v433_v5 = vsel %vm430_vm8, %v425_v3, %v427_v63  ;;  %v431_v6 = vsel %vm430_vm8, %v419_v4, %v421_v57  ;;  %v1549_v57 = vmov 0.0  }
  0xd6   : > { %v1412_v7 = vpack.c.bf16 %v433_v5, %v431_v6 }
  0xd8   : > { %v452_v8 = vpop.permute.xlu1 %451  ;;  %v450_v9 = vpop.permute.xlu0 %449  ;;  %v555_v11 = vld [vmem:[#allocation2 + $0x178] sm:$0xff]  ;;  %1413 = vmatpush1.bf16.msra.mxu0 %v1412_v7 }
  0xd9   : > { %472 = vst.msk [vmem:[#allocation2 + $0x190] sm:$0xff] %vm233_vm0, %v452_v8  ;;  %v461_v12 = vsel %vm459_vm9, %v450_v9, %v452_v8  ;;  %v1440_v13 = vpack.c.bf16 %v555_v11, %v552_v10 }
  0xdb   : > { %1441 = vmatpush1.bf16.msra.mxu1 %v1440_v13 }
  0xdc   : > { %v458_v14 = vpop.permute.xlu1 %457  ;;  %v456_v15 = vpop.permute.xlu0 %455  ;;  %1442 = vmatprep.subr.bf16.mxu1 %v1539_v0 }
  0xdd   : > { %475 = vst.msk [vmem:[#allocation2 + $0x1a8] sm:$0xff] %vm233_vm0, %v458_v14  ;;  %v463_v16 = vsel %vm459_vm9, %v456_v15, %v458_v14 }
  0xde   : > { %v1414_v17 = vpack.c.bf16 %v463_v16, %v461_v12 }
  0xe0   : > { %v454_v18 = vpop.permute.xlu1 %453  ;;  %v448_v19 = vpop.permute.xlu0 %447  ;;  %1415 = vmatprep.subr.bf16.mxu0 %v1414_v17  ;;  %v558_v23 = vld [vmem:[#allocation2 + $0x190] sm:$0xff] }
  0xe1   : > { %v462_v20 = vsel %vm459_vm9, %v454_v18, %v456_v15  ;;  %v460_v21 = vsel %vm459_vm9, %v448_v19, %v450_v9 }
  0xe2   : > { %v1416_v22 = vpack.c.bf16 %v462_v20, %v460_v21 }
  0xe4   : > { %v561_v24 = vld [vmem:[#allocation2 + $0x1a8] sm:$0xff]  ;;  %1417 = vmatpush1.bf16.msra.mxu0 %v1416_v22 }
  0xe5   : > { %v1443_v0 = vpack.c.bf16 %v561_v24, %v558_v23 }
  0xe7   : > { %1444 = vmatpush1.bf16.msra.mxu1 %v1443_v0  ;;  %772 = vmatmul.mubr.f32.vlgmr.msra.gmra.mrb[0].mxu0 %v476_v25 }
  0xe8   : > { %1296 = vmatprep.mubr.msk.f32.mxu0 %vm658_vm1, %v479_v26 }
  0xea   : > { %933 = vmatmul.mubr.f32.vlgmr.msra.gmra.mrb[0].mxu1 %v476_v25 }
  0xeb   : > { %1312 = vmatprep.mubr.msk.f32.mxu1 %vm658_vm1, %v479_v26  ;;  %778 = vmatmul.mubr.f32.gmra.mrb[2].mxu0 %v478_v27 }
  0xec   : > { %1297 = vmatprep.mubr.msk.f32.mxu0 %vm658_vm1, %v481_v28 }
  0xee   : > { %938 = vmatmul.mubr.f32.gmra.mrb[2].mxu1 %v478_v27 }
  0xef   : > { %1313 = vmatprep.mubr.msk.f32.mxu1 %vm658_vm1, %v481_v28  ;;  %784 = vmatmul.mubr.f32.gmra.mrb[4].mxu0 %v480_v29 }
  0xf0   : > { %1298 = vmatprep.mubr.msk.f32.mxu0 %vm658_vm1, %v483_v30 }
  0xf1   : > { %v581_v58 = vpop.permute.xlu0 %580  ;;  %v586_v61 = vpop.permute.xlu1 %585 }
  0xf2   : > { %943 = vmatmul.mubr.f32.gmra.mrb[4].mxu1 %v480_v29 }
  0xf3   : > { %1314 = vmatprep.mubr.msk.f32.mxu1 %vm658_vm1, %v483_v30  ;;  %790 = vmatmul.mubr.f32.gmra.mrb[6].mxu0 %v482_v31 }
  0xf4   : > { %1299 = vmatprep.mubr.msk.f32.mxu0 %vm658_vm1, %v485_v32 }
  0xf5   : > { %v591_v18 = vpop.permute.xlu1 %590  ;;  %v596_v22 = vpop.permute.xlu0 %595 }
  0xf6   : > { %948 = vmatmul.mubr.f32.gmra.mrb[6].mxu1 %v482_v31 }
  0xf7   : > { %1315 = vmatprep.mubr.msk.f32.mxu1 %vm658_vm1, %v485_v32  ;;  %796 = vmatmul.mubr.f32.gmra.mrb[8].mxu0 %v484_v33 }
  0xf8   : > { %1300 = vmatprep.mubr.msk.f32.mxu0 %vm658_vm1, %v487_v34 }
  0xfa   : > { %953 = vmatmul.mubr.f32.gmra.mrb[8].mxu1 %v484_v33 }
  0xfb   : > { %1316 = vmatprep.mubr.msk.f32.mxu1 %vm658_vm1, %v487_v34  ;;  %802 = vmatmul.mubr.f32.gmra.mrb[10].mxu0 %v486_v35 }
  0xfc   : > { %1301 = vmatprep.mubr.msk.f32.mxu0 %vm658_vm1, %v489_v36 }
  0xfe   : > { %958 = vmatmul.mubr.f32.gmra.mrb[10].mxu1 %v486_v35 }
  0xff   : > { %1317 = vmatprep.mubr.msk.f32.mxu1 %vm658_vm1, %v489_v36  ;;  %808 = vmatmul.mubr.f32.gmra.mrb[12].mxu0 %v488_v37 }
 0x100   : > { %1302 = vmatprep.mubr.msk.f32.mxu0 %vm658_vm1, %v491_v38 }
 0x102   : > { %963 = vmatmul.mubr.f32.gmra.mrb[12].mxu1 %v488_v37 }
 0x103   : > { %1318 = vmatprep.mubr.msk.f32.mxu1 %vm658_vm1, %v491_v38  ;;  %814 = vmatmul.mubr.f32.gmra.mrb[14].mxu0 %v490_v39 }
 0x104   : > { %1303 = vmatprep.mubr.msk.f32.mxu0 %vm658_vm1, %v493_v40 }
 0x106   : > { %968 = vmatmul.mubr.f32.gmra.mrb[14].mxu1 %v490_v39 }
 0x107   : > { %1319 = vmatprep.mubr.msk.f32.mxu1 %vm658_vm1, %v493_v40  ;;  %820 = vmatmul.mubr.f32.gmra.mrb[16].mxu0 %v492_v41 }
 0x108   : > { %1304 = vmatprep.mubr.msk.f32.mxu0 %vm658_vm1, %v495_v42 }
 0x10a   : > { %973 = vmatmul.mubr.f32.gmra.mrb[16].mxu1 %v492_v41 }
 0x10b   : > { %1320 = vmatprep.mubr.msk.f32.mxu1 %vm658_vm1, %v495_v42  ;;  %826 = vmatmul.mubr.f32.gmra.mrb[18].mxu0 %v494_v43  ;;  %v601_v42 = vpop.permute.xlu1 %600 }
 0x10c   : > { %1305 = vmatprep.mubr.msk.f32.mxu0 %vm658_vm1, %v497_v44 }
 0x10e   : > { %978 = vmatmul.mubr.f32.gmra.mrb[18].mxu1 %v494_v43 }
 0x10f   : > { %1321 = vmatprep.mubr.msk.f32.mxu1 %vm658_vm1, %v497_v44  ;;  %832 = vmatmul.mubr.f32.gmra.mrb[20].mxu0 %v496_v45 }
 0x110   : > { %1306 = vmatprep.mubr.msk.f32.mxu0 %vm658_vm1, %v499_v46 }
 0x112   : > { %983 = vmatmul.mubr.f32.gmra.mrb[20].mxu1 %v496_v45 }
 0x113   : > { %1322 = vmatprep.mubr.msk.f32.mxu1 %vm658_vm1, %v499_v46  ;;  %838 = vmatmul.mubr.f32.gmra.mrb[22].mxu0 %v498_v47  ;;  %v606_v46 = vpop.permute.xlu0 %605 }
 0x114   : > { %1307 = vmatprep.mubr.msk.f32.mxu0 %vm658_vm1, %v501_v48 }
 0x116   : > { %988 = vmatmul.mubr.f32.gmra.mrb[22].mxu1 %v498_v47 }
 0x117   : > { %1323 = vmatprep.mubr.msk.f32.mxu1 %vm658_vm1, %v501_v48  ;;  %844 = vmatmul.mubr.f32.gmra.mrb[24].mxu0 %v500_v49 }
 0x118   : > { %1308 = vmatprep.mubr.msk.f32.mxu0 %vm658_vm1, %v503_v50 }
 0x11a   : > { %993 = vmatmul.mubr.f32.gmra.mrb[24].mxu1 %v500_v49 }
 0x11b   : > { %1324 = vmatprep.mubr.msk.f32.mxu1 %vm658_vm1, %v503_v50  ;;  %850 = vmatmul.mubr.f32.gmra.mrb[26].mxu0 %v502_v51 }
 0x11c   : > { %1309 = vmatprep.mubr.msk.f32.mxu0 %vm658_vm1, %v505_v52 }
 0x11e   : > { %998 = vmatmul.mubr.f32.gmra.mrb[26].mxu1 %v502_v51 }
 0x11f   : > { %1325 = vmatprep.mubr.msk.f32.mxu1 %vm658_vm1, %v505_v52  ;;  %856 = vmatmul.mubr.f32.gmra.mrb[28].mxu0 %v504_v53 }
 0x120   : > { %1310 = vmatprep.mubr.msk.f32.mxu0 %vm658_vm1, %v507_v54 }
 0x122   : > { %1003 = vmatmul.mubr.f32.gmra.mrb[28].mxu1 %v504_v53 }
 0x123   : > { %1326 = vmatprep.mubr.msk.f32.mxu1 %vm658_vm1, %v507_v54  ;;  %862 = vmatmul.mubr.f32.gmra.mrb[30].mxu0 %v506_v55 }
 0x124   : > { %1139 = vmatprep.mubr.f32.mxu0 %v1549_v57 }
 0x126   : > { %1008 = vmatmul.mubr.f32.gmra.mrb[30].mxu1 %v506_v55 }
 0x127   : > { %1379 = vmatprep.mubr.f32.mxu1 %v1891_v56 }
 0x1ba   : > { %v773_v59 = vpop.f32.mrb[0].mxu0 }
 0x1bb   : > { %v775_v60 = vpop.f32.mrb[1].mxu0  ;;  %v774_v62 = vadd.f32 %v773_v59, %v581_v58 }
 0x1bc   : > { %v776_v1 = vadd.f32 %v775_v60, %v581_v58 }
 0x1bd   : > { %v934_v63 = vpop.f32.mrb[0].mxu1  ;;  %v1013_v8 = vmax.f32 %v774_v62, 0.0 }
 0x1be   : > { %v936_v2 = vpop.f32.mrb[1].mxu1  ;;  %v779_v3 = vpop.f32.mrb[2].mxu0  ;;  %v935_v6 = vadd.f32 %v934_v63, %v581_v58  ;;  %v1014_v11 = vmax.f32 %v776_v1, 0.0 }
 0x1bf   : > { %v780_v4 = vadd.f32 %v779_v3, %v586_v61  ;;  %v781_v5 = vpop.f32.mrb[3].mxu0 }
 0x1c0   : > { %v782_v7 = vadd.f32 %v781_v5, %v586_v61  ;;  %v1015_v19 = vmax.f32 %v935_v6, 0.0  ;;  %v611_v6 = vpop.permute.xlu1 %610 }
 0x1c1   : > { %v939_v9 = vpop.f32.mrb[2].mxu1  ;;  %v1016_v10 = vmax.f32 %v780_v4, 0.0 }
 0x1c2   : > { %v940_v12 = vadd.f32 %v939_v9, %v586_v61  ;;  %v941_v13 = vpop.f32.mrb[3].mxu1  ;;  %v1017_v14 = vmax.f32 %v782_v7, 0.0  ;;  %v785_v15 = vpop.f32.mrb[4].mxu0 }
 0x1c3   : > { %v1447_v16 = vpack.c.bf16 %v1016_v10, %v1013_v8  ;;  %v787_v17 = vpop.f32.mrb[5].mxu0  ;;  %v786_v24 = vadd.f32 %v785_v15, %v591_v18  ;;  %v616_v10 = vpop.permute.xlu0 %615 }
 0x1c4   : > { %v1018_v20 = vmax.f32 %v940_v12, 0.0  ;;  %v1445_v21 = vpack.c.bf16 %v1017_v14, %v1014_v11  ;;  %v788_v26 = vadd.f32 %v787_v17, %v591_v18 }
 0x1c5   : > { %v944_v23 = vpop.f32.mrb[4].mxu1  ;;  %v1019_v33 = vmax.f32 %v786_v24, 0.0 }
 0x1c6   : > { %v1477_v25 = vpack.c.bf16 %v1018_v20, %v1015_v19  ;;  %v946_v0 = vpop.f32.mrb[5].mxu1  ;;  %v791_v27 = vpop.f32.mrb[6].mxu0  ;;  %1446 = vmatprep.subr.bf16.mxu0 %v1445_v21  ;;  %v945_v30 = vadd.f32 %v944_v23, %v591_v18  ;;  %v1020_v36 = vmax.f32 %v788_v26, 0.0 }
 0x1c7   : > { %v792_v28 = vadd.f32 %v791_v27, %v596_v22  ;;  %v793_v29 = vpop.f32.mrb[7].mxu0  ;;  %1448 = vmatpush1.bf16.msra.mxu0 %v1447_v16 }
 0x1c8   : > { %1478 = vmatprep.subr.bf16.mxu1 %v1477_v25  ;;  %v794_v31 = vadd.f32 %v793_v29, %v596_v22  ;;  %v1021_v43 = vmax.f32 %v945_v30, 0.0  ;;  %v621_v30 = vpop.permute.xlu1 %620 }
 0x1c9   : > { %v949_v32 = vpop.f32.mrb[6].mxu1  ;;  %1480 = vmatpush3.bf16.msra.mxu1 %v1477_v25  ;;  %v1022_v34 = vmax.f32 %v792_v28, 0.0 }
 0x1ca   : > { %v950_v35 = vadd.f32 %v949_v32, %v596_v22  ;;  %v951_v37 = vpop.f32.mrb[7].mxu1  ;;  %v1023_v38 = vmax.f32 %v794_v31, 0.0  ;;  %v797_v39 = vpop.f32.mrb[8].mxu0 }
 0x1cb   : > { %v1451_v40 = vpack.c.bf16 %v1022_v34, %v1019_v33  ;;  %v799_v41 = vpop.f32.mrb[9].mxu0  ;;  %v798_v48 = vadd.f32 %v797_v39, %v601_v42  ;;  %v626_v34 = vpop.permute.xlu0 %625 }
 0x1cc   : > { %v1024_v44 = vmax.f32 %v950_v35, 0.0  ;;  %v1449_v45 = vpack.c.bf16 %v1023_v38, %v1020_v36  ;;  %v800_v51 = vadd.f32 %v799_v41, %v601_v42 }
 0x1cd   : > { %v954_v47 = vpop.f32.mrb[8].mxu1  ;;  %v1025_v60 = vmax.f32 %v798_v48, 0.0 }
 0x1ce   : > { %v1481_v49 = vpack.c.bf16 %v1024_v44, %v1021_v43  ;;  %v956_v50 = vpop.f32.mrb[9].mxu1  ;;  %v803_v52 = vpop.f32.mrb[10].mxu0  ;;  %1450 = vmatprep.subr.bf16.mxu0 %v1449_v45  ;;  %v955_v55 = vadd.f32 %v954_v47, %v601_v42  ;;  %v1026_v63 = vmax.f32 %v800_v51, 0.0 }
 0x1cf   : > { %v804_v53 = vadd.f32 %v803_v52, %v606_v46  ;;  %v805_v54 = vpop.f32.mrb[11].mxu0  ;;  %1452 = vmatpush1.bf16.msra.mxu0 %v1451_v40 }
 0x1d0   : > { %1482 = vmatprep.subr.bf16.mxu1 %v1481_v49  ;;  %v806_v58 = vadd.f32 %v805_v54, %v606_v46  ;;  %v1027_v7 = vmax.f32 %v955_v55, 0.0  ;;  %v631_v55 = vpop.permute.xlu1 %630 }
 0x1d1   : > { %v959_v59 = vpop.f32.mrb[10].mxu1  ;;  %1484 = vmatpush3.bf16.msra.mxu1 %v1481_v49  ;;  %v1028_v61 = vmax.f32 %v804_v53, 0.0 }
 0x1d2   : > { %v960_v62 = vadd.f32 %v959_v59, %v606_v46  ;;  %v961_v1 = vpop.f32.mrb[11].mxu1  ;;  %v1029_v2 = vmax.f32 %v806_v58, 0.0  ;;  %v809_v3 = vpop.f32.mrb[12].mxu0 }
 0x1d3   : > { %v1455_v4 = vpack.c.bf16 %v1028_v61, %v1025_v60  ;;  %v811_v5 = vpop.f32.mrb[13].mxu0  ;;  %v810_v12 = vadd.f32 %v809_v3, %v611_v6  ;;  %v636_v61 = vpop.permute.xlu0 %635 }
 0x1d4   : > { %v1030_v8 = vmax.f32 %v960_v62, 0.0  ;;  %v1453_v9 = vpack.c.bf16 %v1029_v2, %v1026_v63  ;;  %v812_v15 = vadd.f32 %v811_v5, %v611_v6 }
 0x1d5   : > { %v964_v11 = vpop.f32.mrb[12].mxu1  ;;  %v1031_v22 = vmax.f32 %v810_v12, 0.0 }
 0x1d6   : > { %v1485_v13 = vpack.c.bf16 %v1030_v8, %v1027_v7  ;;  %v966_v14 = vpop.f32.mrb[13].mxu1  ;;  %v815_v16 = vpop.f32.mrb[14].mxu0  ;;  %1454 = vmatprep.subr.bf16.mxu0 %v1453_v9  ;;  %v965_v19 = vadd.f32 %v964_v11, %v611_v6  ;;  %v1032_v25 = vmax.f32 %v812_v15, 0.0 }
 0x1d7   : > { %v816_v17 = vadd.f32 %v815_v16, %v616_v10  ;;  %v817_v18 = vpop.f32.mrb[15].mxu0  ;;  %1456 = vmatpush1.bf16.msra.mxu0 %v1455_v4 }
 0x1d8   : > { %1486 = vmatprep.subr.bf16.mxu1 %v1485_v13  ;;  %v818_v20 = vadd.f32 %v817_v18, %v616_v10  ;;  %v1033_v31 = vmax.f32 %v965_v19, 0.0  ;;  %v641_v19 = vpop.permute.xlu1 %640 }
 0x1d9   : > { %v969_v21 = vpop.f32.mrb[14].mxu1  ;;  %1488 = vmatpush3.bf16.msra.mxu1 %v1485_v13  ;;  %v1034_v23 = vmax.f32 %v816_v17, 0.0 }
 0x1da   : > { %v970_v24 = vadd.f32 %v969_v21, %v616_v10  ;;  %v971_v0 = vpop.f32.mrb[15].mxu1  ;;  %v1035_v26 = vmax.f32 %v818_v20, 0.0  ;;  %v821_v27 = vpop.f32.mrb[16].mxu0 }
 0x1db   : > { %v1459_v28 = vpack.c.bf16 %v1034_v23, %v1031_v22  ;;  %v823_v29 = vpop.f32.mrb[17].mxu0  ;;  %v822_v36 = vadd.f32 %v821_v27, %v621_v30  ;;  %v646_v23 = vpop.permute.xlu0 %645 }
 0x1dc   : > { %v1036_v32 = vmax.f32 %v970_v24, 0.0  ;;  %v1457_v33 = vpack.c.bf16 %v1035_v26, %v1032_v25  ;;  %v824_v39 = vadd.f32 %v823_v29, %v621_v30 }
 0x1dd   : > { %v974_v35 = vpop.f32.mrb[16].mxu1  ;;  %v1037_v46 = vmax.f32 %v822_v36, 0.0 }
 0x1de   : > { %v1489_v37 = vpack.c.bf16 %v1036_v32, %v1033_v31  ;;  %v976_v38 = vpop.f32.mrb[17].mxu1  ;;  %v827_v40 = vpop.f32.mrb[18].mxu0  ;;  %1458 = vmatprep.subr.bf16.mxu0 %v1457_v33  ;;  %v975_v43 = vadd.f32 %v974_v35, %v621_v30  ;;  %v1038_v49 = vmax.f32 %v824_v39, 0.0 }
 0x1df   : > { %v828_v41 = vadd.f32 %v827_v40, %v626_v34  ;;  %v829_v42 = vpop.f32.mrb[19].mxu0  ;;  %1460 = vmatpush1.bf16.msra.mxu0 %v1459_v28 }
 0x1e0   : > { %1490 = vmatprep.subr.bf16.mxu1 %v1489_v37  ;;  %v830_v44 = vadd.f32 %v829_v42, %v626_v34  ;;  %v1039_v58 = vmax.f32 %v975_v43, 0.0  ;;  %v651_v43 = vpop.permute.xlu1 %650 }
 0x1e1   : > { %v979_v45 = vpop.f32.mrb[18].mxu1  ;;  %1492 = vmatpush3.bf16.msra.mxu1 %v1489_v37  ;;  %v1040_v47 = vmax.f32 %v828_v41, 0.0 }
 0x1e2   : > { %v980_v48 = vadd.f32 %v979_v45, %v626_v34  ;;  %v981_v50 = vpop.f32.mrb[19].mxu1  ;;  %v1041_v51 = vmax.f32 %v830_v44, 0.0  ;;  %v833_v52 = vpop.f32.mrb[20].mxu0 }
 0x1e3   : > { %v1463_v53 = vpack.c.bf16 %v1040_v47, %v1037_v46  ;;  %v835_v54 = vpop.f32.mrb[21].mxu0  ;;  %v834_v63 = vadd.f32 %v833_v52, %v631_v55  ;;  %v656_v47 = vpop.permute.xlu0 %655 }
 0x1e4   : > { %v1042_v59 = vmax.f32 %v980_v48, 0.0  ;;  %v1461_v60 = vpack.c.bf16 %v1041_v51, %v1038_v49  ;;  %v836_v3 = vadd.f32 %v835_v54, %v631_v55 }
 0x1e5   : > { %v984_v62 = vpop.f32.mrb[20].mxu1  ;;  %v1043_v10 = vmax.f32 %v834_v63, 0.0 }
 0x1e6   : > { %v1493_v1 = vpack.c.bf16 %v1042_v59, %v1039_v58  ;;  %v986_v2 = vpop.f32.mrb[21].mxu1  ;;  %v839_v4 = vpop.f32.mrb[22].mxu0  ;;  %1462 = vmatprep.subr.bf16.mxu0 %v1461_v60  ;;  %v985_v7 = vadd.f32 %v984_v62, %v631_v55  ;;  %v1044_v13 = vmax.f32 %v836_v3, 0.0 }
 0x1e7   : > { %v840_v5 = vadd.f32 %v839_v4, %v636_v61  ;;  %v841_v6 = vpop.f32.mrb[23].mxu0  ;;  %1464 = vmatpush1.bf16.msra.mxu0 %v1463_v53 }
 0x1e8   : > { %1494 = vmatprep.subr.bf16.mxu1 %v1493_v1  ;;  %v842_v8 = vadd.f32 %v841_v6, %v636_v61  ;;  %v1045_v20 = vmax.f32 %v985_v7, 0.0 }
 0x1e9   : > { %v989_v9 = vpop.f32.mrb[22].mxu1  ;;  %1496 = vmatpush3.bf16.msra.mxu1 %v1493_v1  ;;  %v1046_v11 = vmax.f32 %v840_v5, 0.0 }
 0x1ea   : > { %v990_v12 = vadd.f32 %v989_v9, %v636_v61  ;;  %v991_v14 = vpop.f32.mrb[23].mxu1  ;;  %v1047_v15 = vmax.f32 %v842_v8, 0.0  ;;  %v845_v16 = vpop.f32.mrb[24].mxu0  ;;  %v1062_v9 = vld [vmem:[%s1913_s3 + $0x8] sm:$0xff] }
 0x1eb   : > { %v1467_v17 = vpack.c.bf16 %v1046_v11, %v1043_v10  ;;  %v847_v18 = vpop.f32.mrb[25].mxu0  ;;  %v846_v25 = vadd.f32 %v845_v16, %v641_v19  ;;  %v1068_v10 = vpop.permute.xlu1 %1067 }
 0x1ec   : > { %v1048_v21 = vmax.f32 %v990_v12, 0.0  ;;  %v1465_v22 = vpack.c.bf16 %v1047_v15, %v1044_v13  ;;  %v848_v27 = vadd.f32 %v847_v18, %v641_v19  ;;  %v1073_v14 = vpop.permute.xlu0 %1072 }
 0x1ed   : > { %v994_v24 = vpop.f32.mrb[24].mxu1  ;;  %v1049_v34 = vmax.f32 %v846_v25, 0.0 }
 0x1ee   : > { %v1497_v0 = vpack.c.bf16 %v1048_v21, %v1045_v20  ;;  %v996_v26 = vpop.f32.mrb[25].mxu1  ;;  %v851_v28 = vpop.f32.mrb[26].mxu0  ;;  %1466 = vmatprep.subr.bf16.mxu0 %v1465_v22  ;;  %v995_v31 = vadd.f32 %v994_v24, %v641_v19  ;;  %v1050_v37 = vmax.f32 %v848_v27, 0.0 }
 0x1ef   : > { %v852_v29 = vadd.f32 %v851_v28, %v646_v23  ;;  %v853_v30 = vpop.f32.mrb[27].mxu0  ;;  %1468 = vmatpush1.bf16.msra.mxu0 %v1467_v17 }
 0x1f0   : > { %1498 = vmatprep.subr.bf16.mxu1 %v1497_v0  ;;  %v854_v32 = vadd.f32 %v853_v30, %v646_v23  ;;  %v1051_v44 = vmax.f32 %v995_v31, 0.0 }
 0x1f1   : > { %v999_v33 = vpop.f32.mrb[26].mxu1  ;;  %1500 = vmatpush3.bf16.msra.mxu1 %v1497_v0  ;;  %v1052_v35 = vmax.f32 %v852_v29, 0.0 }
 0x1f2   : > { %v1000_v36 = vadd.f32 %v999_v33, %v646_v23  ;;  %v1001_v38 = vpop.f32.mrb[27].mxu1  ;;  %v1053_v39 = vmax.f32 %v854_v32, 0.0  ;;  %v857_v40 = vpop.f32.mrb[28].mxu0 }
 0x1f3   : > { %v1471_v41 = vpack.c.bf16 %v1052_v35, %v1049_v34  ;;  %v859_v42 = vpop.f32.mrb[29].mxu0  ;;  %v858_v49 = vadd.f32 %v857_v40, %v651_v43 }
 0x1f4   : > { %v1054_v45 = vmax.f32 %v1000_v36, 0.0  ;;  %v1469_v46 = vpack.c.bf16 %v1053_v39, %v1050_v37  ;;  %v860_v52 = vadd.f32 %v859_v42, %v651_v43 }
 0x1f5   : > { %v1004_v48 = vpop.f32.mrb[28].mxu1  ;;  %v1055_v61 = vmax.f32 %v858_v49, 0.0 }
 0x1f6   : > { %v1501_v50 = vpack.c.bf16 %v1054_v45, %v1051_v44  ;;  %v1006_v51 = vpop.f32.mrb[29].mxu1  ;;  %v863_v53 = vpop.f32.mrb[30].mxu0  ;;  %1470 = vmatprep.subr.bf16.mxu0 %v1469_v46  ;;  %v1005_v58 = vadd.f32 %v1004_v48, %v651_v43  ;;  %v1056_v1 = vmax.f32 %v860_v52, 0.0 }
 0x1f7   : > { %v864_v54 = vadd.f32 %v863_v53, %v656_v47  ;;  %v865_v55 = vpop.f32.mrb[31].mxu0  ;;  %1472 = vmatpush1.bf16.msra.mxu0 %v1471_v41 }
 0x1f8   : > { %1502 = vmatprep.subr.bf16.mxu1 %v1501_v50  ;;  %v866_v59 = vadd.f32 %v865_v55, %v656_v47  ;;  %v1057_v5 = vmax.f32 %v1005_v58, 0.0 }
 0x1f9   : > { %v1009_v60 = vpop.f32.mrb[30].mxu1  ;;  %1504 = vmatpush3.bf16.msra.mxu1 %v1501_v50  ;;  %v1058_v62 = vmax.f32 %v864_v54, 0.0 }
 0x1fa   : > { %v1010_v63 = vadd.f32 %v1009_v60, %v656_v47  ;;  %v1059_v2 = vmax.f32 %v866_v59, 0.0  ;;  %v1011_v3 = vpop.f32.mrb[31].mxu1 }
 0x1fb   : > { %v1475_v4 = vpack.c.bf16 %v1058_v62, %v1055_v61 }
 0x1fc   : > { %v1060_v6 = vmax.f32 %v1010_v63, 0.0  ;;  %v1473_v7 = vpack.c.bf16 %v1059_v2, %v1056_v1 }
 0x1fe   : > { %v1505_v8 = vpack.c.bf16 %v1060_v6, %v1057_v5  ;;  %1474 = vmatprep.subr.bf16.mxu0 %v1473_v7 }
 0x1ff   : > { %1476 = vmatpush1.bf16.msra.mxu0 %v1475_v4 }
 0x200   : > { %1506 = vmatprep.subr.bf16.mxu1 %v1505_v8 }
 0x201   : > { %1508 = vmatpush3.bf16.msra.mxu1 %v1505_v8 }
 0x202   : > { %1140 = vmatmul.mubr.f32.vlgmr.msra.gmra.mrb[32].mxu0 %v1891_v56 }
 0x203   : > { %1145 = vmatprep.mubr.f32.mxu0 %v1549_v57 }
 0x204   : > { %1380 = vmatmul.mubr.f32.vlgmr.msra.gmra.mrb[32].mxu1 %v1062_v9 }
 0x206   : > { %1146 = vmatmul.mubr.f32.gmra.mrb[34].mxu0 %v1062_v9 }
 0x2d5   : > { %v1141_v11 = vpop.f32.mrb[32].mxu0 }
 0x2d6   : > { %v1142_v12 = vadd.f32 %v1141_v11, %v1068_v10  ;;  %v1143_v13 = vpop.f32.mrb[33].mxu0 }
 0x2d7   : > { %v1381_v15 = vpop.f32.mrb[32].mxu1  ;;  %v1144_v16 = vadd.f32 %v1143_v13, %v1068_v10 }
 0x2d8   : > { %v1224_v17 = vadd.f32 %v1381_v15, %v1073_v14  ;;  %v1218_v18 = vpop.f32.mrb[33].mxu1  ;;  %1227 = vst [vmem:[%s224_s28] sm:$0xff] %v1142_v12 }
 0x2d9   : > { %v1219_v56 = vadd.f32 %v1218_v18, %v1068_v10  ;;  %1228 = vst [vmem:[%s224_s28 + $0x8] sm:$0xff] %v1144_v16  ;;  %v1147_v57 = vpop.f32.mrb[34].mxu0 }
 0x2da   : > { %1232 = vst.msk [vmem:[%s224_s28 + $0x28] sm:$0xff] %vm233_vm0, %v1224_v17  ;;  %v1148_v19 = vadd.f32 %v1147_v57, %v1073_v14  ;;  %v1149_v20 = vpop.f32.mrb[35].mxu0 }
 0x2db   : > { %1229 = vst.msk [vmem:[%s224_s28 + $0x10] sm:$0xff] %vm233_vm0, %v1219_v56  ;;  %v1150_v21 = vadd.f32 %v1149_v20, %v1073_v14 }
 0x2dc   : > { %1230 = vst [vmem:[%s224_s28 + $0x18] sm:$0xff] %v1148_v19 }
 0x2dd   : > { %1231 = vst [vmem:[%s224_s28 + $0x20] sm:$0xff] %v1150_v21 }
 0x2de PF: > { %s15_s18 = sadd.s32 1, %s1537_s18  }
 0x2df   : > { %p12_p4 = scmp.ge.s32.totalorder %s15_s18, 4  }
 0x2e1   :  { %14 = sbr.rel (!%p12_p4) target bundleno = 1 (0x1), region = 70 }

</bundles_post_ra>
